<compile_context>
chip_gen: v6e
topology: v6e:2x2x1
jax: 0.10.0
libtpu: 0.0.40
codegen_flags: <defaults>
</compile_context>

<pallas_src>
import functools

import jax
import jax.numpy as jnp
from jax.experimental import pallas as pl
from jax.experimental.pallas import tpu as pltpu

DIGIT_SHAPE = {'width': 10, 'height': 14, 'channels': 3}

DEFAULT_TILE_B = 2048  # rows per grid step; fits comfortably in scoped VMEM on all chips


def _round_up(x, m):
    return ((x + m - 1) // m) * m


def _mlp_kernel(x_ref, w1_ref, b1_ref, w2_ref, b2_ref, o_ref, *, num_classes):
    # x_ref : (TILE_B, F_pad)  bf16
    # w1_ref: (F_pad, H_pad)   bf16      b1_ref: (1, H_pad) f32
    # w2_ref: (H_pad, O_pad)   bf16      b2_ref: (1, O_pad) f32
    # o_ref : (TILE_B, O_pad)  f32  (lane-dense; caller slices [:, :num_classes])

    # fc1 + ReLU (MXU matmul with f32 accumulation, epilogue in f32)
    h = jnp.dot(x_ref[...], w1_ref[...], preferred_element_type=jnp.float32)
    h = jnp.maximum(h + b1_ref[...], 0.0)

    # fc2 (cast activations to bf16 for the native MXU path)
    logits = jnp.dot(h.astype(jnp.bfloat16), w2_ref[...],
                     preferred_element_type=jnp.float32)
    logits = logits + b2_ref[...]

    # Mask padded class columns so LogSoftmax only sees the real classes.
    col = jax.lax.broadcasted_iota(jnp.int32, logits.shape, dimension=1)
    logits = jnp.where(col < num_classes, logits, -jnp.inf)

    # Numerically stable LogSoftmax along the last axis (== torch dim=1)
    m = jnp.max(logits, axis=-1, keepdims=True)
    shifted = logits - m
    lse = jnp.log(jnp.sum(jnp.exp(shifted), axis=-1, keepdims=True))
    o_ref[...] = (shifted - lse).astype(o_ref.dtype)


def mlp_forward(x, w1, b1, w2, b2, *, tile_b=DEFAULT_TILE_B):
    """x: (..., height, width) float32 -> (B, out_size) log-probs.

    w1: (F, H), b1: (H,), w2: (H, O), b2: (O,)  (weights pre-transposed to
    (in_features, out_features), matching torch Linear semantics y = x @ W.T + b).
    """
    F = DIGIT_SHAPE['height'] * DIGIT_SHAPE['width']
    x2d = x.reshape(-1, F).astype(jnp.float32)          # == torch x.view(-1, H*W)
    B = x2d.shape[0]
    H = w1.shape[1]
    O = w2.shape[1]

    # Lane-dense padded dims (multiples of 128 on the last axis).
    F_pad = _round_up(F, 128)   # 140 -> 256
    H_pad = _round_up(H, 128)   # 32  -> 128
    O_pad = _round_up(O, 128)   # 10  -> 128

    # Batch tiling: clamp tile size for tiny batches, pad B to a tile multiple.
    tile_b = max(8, min(tile_b, _round_up(B, 8)))
    B_pad = _round_up(B, tile_b)
    grid = (B_pad // tile_b,)

    # Zero-pad everything once in the wrapper (padding is semantics-preserving:
    # padded pixels/hidden units contribute exactly 0; padded classes are masked
    # inside the kernel and sliced off below).
    x_p = jnp.pad(x2d, ((0, B_pad - B), (0, F_pad - F))).astype(jnp.bfloat16)
    w1_p = jnp.pad(w1.astype(jnp.float32),
                   ((0, F_pad - F), (0, H_pad - H))).astype(jnp.bfloat16)
    b1_p = jnp.pad(b1.astype(jnp.float32), (0, H_pad - H)).reshape(1, H_pad)
    w2_p = jnp.pad(w2.astype(jnp.float32),
                   ((0, H_pad - H), (0, O_pad - O))).astype(jnp.bfloat16)
    b2_p = jnp.pad(b2.astype(jnp.float32), (0, O_pad - O)).reshape(1, O_pad)

    kernel = functools.partial(_mlp_kernel, num_classes=O)

    out_padded = pl.pallas_call(
        kernel,
        out_shape=jax.ShapeDtypeStruct((B_pad, O_pad), jnp.float32),
        grid=grid,
        in_specs=[
            pl.BlockSpec((tile_b, F_pad), lambda i: (i, 0)),   # x: tiled over batch
            pl.BlockSpec((F_pad, H_pad), lambda i: (0, 0)),    # w1: VMEM-resident
            pl.BlockSpec((1, H_pad),     lambda i: (0, 0)),    # b1: VMEM-resident
            pl.BlockSpec((H_pad, O_pad), lambda i: (0, 0)),    # w2: VMEM-resident
            pl.BlockSpec((1, O_pad),     lambda i: (0, 0)),    # b2: VMEM-resident
        ],
        out_specs=pl.BlockSpec((tile_b, O_pad), lambda i: (i, 0)),
        compiler_params=pltpu.CompilerParams(
            dimension_semantics=("parallel",),                 # v7x: both TCs
        ),
    )(x_p, w1_p, b1_p, w2_p, b2_p)

    return out_padded[:B, :O]


def init_params(key, input_size, hidden_size, out_size):
    """Deterministic init mimicking torch.nn.Linear defaults (U(-k, k), k=1/sqrt(fan_in))."""
    F = input_size[0] * input_size[1]
    k1, k2, k3, k4 = jax.random.split(key, 4)
    bound1 = 1.0 / jnp.sqrt(F)
    bound2 = 1.0 / jnp.sqrt(hidden_size)
    # stored pre-transposed: (in_features, out_features)
    w1 = jax.random.uniform(k1, (F, hidden_size), jnp.float32, -bound1, bound1)
    b1 = jax.random.uniform(k2, (hidden_size,), jnp.float32, -bound1, bound1)
    w2 = jax.random.uniform(k3, (hidden_size, out_size), jnp.float32, -bound2, bound2)
    b2 = jax.random.uniform(k4, (out_size,), jnp.float32, -bound2, bound2)
    return w1, b1, w2, b2


def _mlp_reference(x, w1, b1, w2, b2):
    """Pure-JAX f32 reference for correctness checking."""
    F = DIGIT_SHAPE['height'] * DIGIT_SHAPE['width']
    x2d = x.reshape(-1, F).astype(jnp.float32)
    h = jnp.maximum(x2d @ w1 + b1, 0.0)
    logits = h @ w2 + b2
    return jax.nn.log_softmax(logits, axis=-1)


if __name__ == "__main__":
    key = jax.random.PRNGKey(0)
    k_params, k_x = jax.random.split(key)

    input_size = (DIGIT_SHAPE['height'], DIGIT_SHAPE['width'])  # (14, 10)
    hidden_size = 32
    out_size = 10
    batch = 4

    w1, b1, w2, b2 = init_params(k_params, input_size, hidden_size, out_size)
    x = jax.random.normal(k_x, (batch, input_size[0], input_size[1]), jnp.float32)

    out = mlp_forward(x, w1, b1, w2, b2)
    out = jax.block_until_ready(out)

    assert out.shape == (batch, out_size)

    # sanity 1: log-softmax rows should exponentiate-and-sum to ~1
    row_sums = jnp.sum(jnp.exp(out), axis=1)
    assert bool(jnp.all(jnp.abs(row_sums - 1.0) < 1e-3)), row_sums

    # sanity 2: close to f32 pure-JAX reference (bf16 MXU operands -> loose tol)
    ref = _mlp_reference(x, w1, b1, w2, b2)
    assert bool(jnp.all(jnp.abs(out - ref) < 5e-2)), float(jnp.max(jnp.abs(out - ref)))

    print("KERNEL_OK")
</pallas_src>

<mosaic_0001>
module attributes {stable_mosaic.version = 11 : i64} {
  func.func @_mlp_kernel(%arg0: i32, %arg1: memref<8x256xbf16, #tpu.memory_space<vmem>>, %arg2: memref<256x128xbf16, #tpu.memory_space<vmem>>, %arg3: memref<1x128xf32, #tpu.memory_space<vmem>>, %arg4: memref<128x128xbf16, #tpu.memory_space<vmem>>, %arg5: memref<1x128xf32, #tpu.memory_space<vmem>>, %arg6: memref<8x128xf32, #tpu.memory_space<vmem>>) attributes {dimension_semantics = [#tpu.dimension_semantics<parallel>], iteration_bounds = array<i64: 1>, scalar_prefetch = 0 : i64, scratch_operands = 0 : i64, tpu.core_type = #tpu.core_type<tc>, window_params = [{transform_indices = @transform_0, window_bounds = array<i64: 8, 256>}, {pipeline_mode = #tpu.pipeline_mode<synchronous>, transform_indices = @transform_1, window_bounds = array<i64: 256, 128>}, {pipeline_mode = #tpu.pipeline_mode<synchronous>, transform_indices = @transform_2, window_bounds = array<i64: 1, 128>}, {pipeline_mode = #tpu.pipeline_mode<synchronous>, transform_indices = @transform_3, window_bounds = array<i64: 128, 128>}, {pipeline_mode = #tpu.pipeline_mode<synchronous>, transform_indices = @transform_4, window_bounds = array<i64: 1, 128>}, {transform_indices = @transform_5, window_bounds = array<i64: 8, 128>}]} {
    %c0 = arith.constant 0 : index
    %c0_0 = arith.constant 0 : index
    %0 = vector.load %arg1[%c0, %c0_0] : memref<8x256xbf16, #tpu.memory_space<vmem>>, vector<8x256xbf16>
    %c0_1 = arith.constant 0 : index
    %c0_2 = arith.constant 0 : index
    %1 = vector.load %arg2[%c0_1, %c0_2] : memref<256x128xbf16, #tpu.memory_space<vmem>>, vector<256x128xbf16>
    %cst = arith.constant dense<0.000000e+00> : vector<8x128xf32>
    %2 = tpu.matmul %0, %1, %cst {dimension_numbers = #tpu.dot_dimension_numbers<[1], [0], [0], [1], [0, 0, 1, 1], [], []>} : vector<8x256xbf16>, vector<256x128xbf16>, vector<8x128xf32> -> vector<8x128xf32>
    %c0_3 = arith.constant 0 : index
    %c0_4 = arith.constant 0 : index
    %3 = vector.load %arg3[%c0_3, %c0_4] : memref<1x128xf32, #tpu.memory_space<vmem>>, vector<1x128xf32>
    %4 = vector.broadcast %3 : vector<1x128xf32> to vector<8x128xf32>
    %5 = arith.addf %2, %4 : vector<8x128xf32>
    %cst_5 = arith.constant 0.000000e+00 : f32
    %6 = vector.broadcast %cst_5 : f32 to vector<8x128xf32>
    %7 = arith.maximumf %5, %6 : vector<8x128xf32>
    %8 = arith.truncf %7 : vector<8x128xf32> to vector<8x128xbf16>
    %c0_6 = arith.constant 0 : index
    %c0_7 = arith.constant 0 : index
    %9 = vector.load %arg4[%c0_6, %c0_7] : memref<128x128xbf16, #tpu.memory_space<vmem>>, vector<128x128xbf16>
    %cst_8 = arith.constant dense<0.000000e+00> : vector<8x128xf32>
    %10 = tpu.matmul %8, %9, %cst_8 {dimension_numbers = #tpu.dot_dimension_numbers<[1], [0], [0], [1], [0, 0, 1, 1], [], []>} : vector<8x128xbf16>, vector<128x128xbf16>, vector<8x128xf32> -> vector<8x128xf32>
    %c0_9 = arith.constant 0 : index
    %c0_10 = arith.constant 0 : index
    %11 = vector.load %arg5[%c0_9, %c0_10] : memref<1x128xf32, #tpu.memory_space<vmem>>, vector<1x128xf32>
    %12 = vector.broadcast %11 : vector<1x128xf32> to vector<8x128xf32>
    %13 = arith.addf %10, %12 : vector<8x128xf32>
    %14 = tpu.iota {dimensions = array<i32: 1>} : vector<8x128xi32>
    %c10_i32 = arith.constant 10 : i32
    %15 = vector.broadcast %c10_i32 : i32 to vector<8x128xi32>
    %16 = arith.cmpi slt, %14, %15 : vector<8x128xi32>
    %cst_11 = arith.constant 0xFF800000 : f32
    %17 = vector.broadcast %cst_11 : f32 to vector<8x128xf32>
    %18 = arith.select %16, %13, %17 : vector<8x128xi1>, vector<8x128xf32>
    %cst_12 = arith.constant dense<0xFF800000> : vector<8xf32>
    %19 = vector.multi_reduction <maximumf>, %18, %cst_12 [1] : vector<8x128xf32> to vector<8xf32>
    %20 = vector.shape_cast %19 : vector<8xf32> to vector<8x1xf32>
    %21 = vector.broadcast %20 : vector<8x1xf32> to vector<8x128xf32>
    %22 = arith.subf %18, %21 : vector<8x128xf32>
    %23 = math.exp %22 : vector<8x128xf32>
    %cst_13 = arith.constant dense<0.000000e+00> : vector<8xf32>
    %24 = vector.multi_reduction <add>, %23, %cst_13 [1] : vector<8x128xf32> to vector<8xf32>
    %25 = vector.shape_cast %24 : vector<8xf32> to vector<8x1xf32>
    %26 = math.log %25 : vector<8x1xf32>
    %27 = vector.broadcast %26 : vector<8x1xf32> to vector<8x128xf32>
    %28 = arith.subf %22, %27 : vector<8x128xf32>
    %c0_14 = arith.constant 0 : index
    %c0_15 = arith.constant 0 : index
    %29 = vector.load %arg6[%c0_14, %c0_15] : memref<8x128xf32, #tpu.memory_space<vmem>>, vector<8x128xf32>
    tpu.vector_store %arg6[%c0_14, %c0_15], %28 {strides = array<i32>} : memref<8x128xf32, #tpu.memory_space<vmem>>, vector<8x128xf32>,
    return
  }
  func.func @transform_0(%arg0: i32) -> (i32, i32) {
    %c0_i32 = arith.constant 0 : i32
    %c0_i32_0 = arith.constant 0 : i32
    return %arg0, %c0_i32 : i32, i32
  }
  func.func @transform_1(%arg0: i32) -> (i32, i32) {
    %c0_i32 = arith.constant 0 : i32
    %c0_i32_0 = arith.constant 0 : i32
    %c0_i32_1 = arith.constant 0 : i32
    return %c0_i32, %c0_i32_0 : i32, i32
  }
  func.func @transform_2(%arg0: i32) -> (i32, i32) {
    %c0_i32 = arith.constant 0 : i32
    %c0_i32_0 = arith.constant 0 : i32
    %c0_i32_1 = arith.constant 0 : i32
    return %c0_i32, %c0_i32_0 : i32, i32
  }
  func.func @transform_3(%arg0: i32) -> (i32, i32) {
    %c0_i32 = arith.constant 0 : i32
    %c0_i32_0 = arith.constant 0 : i32
    %c0_i32_1 = arith.constant 0 : i32
    return %c0_i32, %c0_i32_0 : i32, i32
  }
  func.func @transform_4(%arg0: i32) -> (i32, i32) {
    %c0_i32 = arith.constant 0 : i32
    %c0_i32_0 = arith.constant 0 : i32
    %c0_i32_1 = arith.constant 0 : i32
    return %c0_i32, %c0_i32_0 : i32, i32
  }
  func.func @transform_5(%arg0: i32) -> (i32, i32) {
    %c0_i32 = arith.constant 0 : i32
    %c0_i32_0 = arith.constant 0 : i32
    return %arg0, %c0_i32 : i32, i32
  }
}

</mosaic_0001>

<bundles_post_ra>
// kernel: tpu_custom_call.1
= control target key start
LH: loop header
LB: loop body
LE: loop exit
PB: predicated region body
PF: predicated region fallthrough
CT: control target
= control target key end

     0   :  { %10 = vsyncpa [#allocation3], 0  ;;  %s656_s0 = inlined_call_operand.hbm [shape: bf16[8,256], index: 0, kind: input, shape index: {}]   ;;  %s657_s1 = inlined_call_operand.hbm [shape: bf16[256,128], index: 1, kind: input, shape index: {}]   ;;  %s658_s2 = inlined_call_operand.vmem [shape: f32[1,128], index: 2, kind: input, shape index: {}]   ;;  %s659_s3 = inlined_call_operand.hbm [shape: bf16[128,128], index: 3, kind: input, shape index: {}]   ;;  %s660_s4 = inlined_call_operand.vmem [shape: f32[1,128], index: 4, kind: input, shape index: {}]   ;;  %s661_s5 = inlined_call_operand.hbm [shape: f32[8,128], index: 5, kind: output, shape index: {}]  }
   0x1   :  { %11 = vsyncpa [#allocation6], 0 }
   0x2   :  { %12 = vsyncpa [#allocation4], 0  ;;  %s591_s18 = smov [#allocation5]  }
   0x3   :  { %s28_s19 = sshll.u32 %s591_s18, 4  ;;  %s29_s19 = int_to_ptr.vmem [resolvable:$true] %s28_s19 }
   0x4   :  { %s513_s20 = scalar_lea.vmem %s29_s19, 2048  ;;  %p518_p1 = scmp.lt.s32.totalorder %s29_s19, %s29_s19 }
   0x5   :  { %p514_p0 = scmp.ne.s32.totalorder %s29_s19, %s513_s20  ;;  %p519_p2 = scmp.lt.s32.totalorder %s513_s20, %s513_s20 }
   0x7   :  { %p520_p3 = por %p519_p2, %p518_p1 }
   0x9   :  { %p521_p4 = pnand %p520_p3, %p514_p0 }
   0xb   :  { %524 = shalt.err (!%p521_p4)
}
   0xc   :  { %s592_s21 = smov 64   ;;  %s593_s22 = smov 4  }
   0xd   :  { %34 = dma.hbm_to_vmem [thread:$0]  %s657_s1, 2048, %s29_s19, [#allocation6], %s592_s21, %s592_s21, %s593_s22  }
   0xe   :  { %s594_s25 = smov [#allocation2]   ;;  %s595_s27 = smov [#allocation7]  }
   0xf   :  { %s19_s26 = sshll.u32 %s594_s25, 4  ;;  %s42_s28 = sshll.u32 %s595_s27, 4  ;;  %s20_s26 = int_to_ptr.vmem [resolvable:$true] %s19_s26  ;;  %s43_s28 = int_to_ptr.vmem [resolvable:$true] %s42_s28 }
  0x10   :  { %s533_s29 = scalar_lea.vmem %s20_s26, 128  ;;  %p538_p6 = scmp.lt.s32.totalorder %s20_s26, %s20_s26 }
  0x11   :  { %p534_p5 = scmp.ne.s32.totalorder %s20_s26, %s533_s29  ;;  %p539_p7 = scmp.lt.s32.totalorder %s533_s29, %s533_s29 }
  0x13   :  { %p540_p8 = por %p539_p7, %p538_p6 }
  0x15   :  { %p541_p9 = pnand %p540_p8, %p534_p5 }
  0x17   :  { %544 = shalt.err (!%p541_p9)
}
  0x18   :  { %22 = dma.hbm_to_vmem [thread:$0]  %s656_s0, 128, %s20_s26, [#allocation3]  }
  0x19   :  { %s553_s7 = scalar_lea.vmem %s43_s28, 1024  ;;  %p558_p11 = scmp.lt.s32.totalorder %s43_s28, %s43_s28 }
  0x1a   :  { %p554_p10 = scmp.ne.s32.totalorder %s43_s28, %s553_s7  ;;  %p559_p12 = scmp.lt.s32.totalorder %s553_s7, %s553_s7 }
  0x1c   :  { %p560_p13 = por %p559_p12, %p558_p11 }
  0x1e   :  { %p561_p0 = pnand %p560_p13, %p554_p10 }
  0x20   :  { %564 = shalt.err (!%p561_p0)
}
  0x21   :  { %48 = dma.hbm_to_vmem [thread:$0]  %s659_s3, 1024, %s43_s28, [#allocation6], %s592_s21, %s592_s21, %s593_s22  }
  0x22   :  { %585 = dma.done.wait [#allocation3], 128  }
  0x23   :  { %586 = vsyncadd [#allocation3], 4294967168 }
  0x24   :  { %587 = dma.done.wait [#allocation6], 3072  }
  0x25   :  { %588 = vsyncadd [#allocation6], 4294964224  ;;  %v596_v0 = vmov 0.0   ;;  %v475_v1 = vld [vmem:[#allocation5 + $0x78] sm:$0xff]   ;;  %v477_v3 = vld [vmem:[#allocation5 + $0x70] sm:$0xff]   ;;  %vm597_vm0 = vmmov 0   ;;  %v357_v37 = vlaneseq }
  0x26   :  { %447 = vmatprep.subr.bf16.mxu1 %v596_v0  ;;  %v476_v2 = vld [vmem:[#allocation5 + $0x38] sm:$0xff]   ;;  %416 = vmatprep.subr.bf16.mxu0 %v475_v1  ;;  %v478_v4 = vld [vmem:[#allocation5 + $0x30] sm:$0xff]   ;;  %v479_v5 = vld [vmem:[#allocation5 + $0x68] sm:$0xff]  }
  0x27   :  { %417 = vmatpush3.bf16.msra.mxu0 %v476_v2  ;;  %v480_v6 = vld [vmem:[#allocation5 + $0x28] sm:$0xff]   ;;  %v481_v7 = vld [vmem:[#allocation5 + $0x60] sm:$0xff]   ;;  %v483_v9 = vld [vmem:[#allocation5 + $0x58] sm:$0xff]   ;;  %463 = vmatprep.mubr.msk.bf16.mxu1 %vm597_vm0, %v596_v0  ;;  %v358_v38 = vand.u32 127, %v357_v37 }
  0x28   :  { %418 = vmatprep.subr.bf16.mxu0 %v477_v3  ;;  %v482_v8 = vld [vmem:[#allocation5 + $0x20] sm:$0xff]   ;;  %v484_v10 = vld [vmem:[#allocation5 + $0x18] sm:$0xff]   ;;  %v485_v11 = vld [vmem:[#allocation5 + $0x50] sm:$0xff]  }
  0x29   :  { %v61_v12 = vld [vmem:[#allocation2] sm:$0xff]  ;;  %v486_v15 = vld [vmem:[#allocation5 + $0x10] sm:$0xff]   ;;  %v487_v16 = vld [vmem:[#allocation5 + $0x48] sm:$0xff]   ;;  %vm359_vm1 = vcmp.lt.s32.totalorder %v358_v38, 10 }
  0x2a   :  { %v390_v13 = vcombine.high %v61_v12, %v61_v12  ;;  %v493_v14 = vld [vmem:[#allocation7 + $0x38] sm:$0xff]   ;;  %v494_v17 = vld [vmem:[#allocation7 + $0x30] sm:$0xff]   ;;  %v488_v18 = vld [vmem:[#allocation5 + $0x8] sm:$0xff]   ;;  %v389_v23 = vcombine.low %v61_v12, %v61_v12 }
  0x2b   :  { %419 = vmatpush3.bf16.msra.mxu0 %v478_v4  ;;  %448 = vmatpush3.bf16.msra.mxu1 %v493_v14  ;;  %v489_v19 = vld [vmem:[#allocation5 + $0x40] sm:$0xff]   ;;  %v495_v20 = vld [vmem:[#allocation7 + $0x28] sm:$0xff]   ;;  %v497_v24 = vld [vmem:[#allocation7 + $0x18] sm:$0xff]  }
  0x2c   :  { %420 = vmatprep.subr.bf16.mxu0 %v479_v5  ;;  %236 = vmatprep.mubr.bf16.mxu0 %v390_v13  ;;  %v490_v21 = vld [vmem:[#allocation5] sm:$0xff]   ;;  %v498_v25 = vld [vmem:[#allocation7 + $0x10] sm:$0xff]   ;;  %v499_v26 = vld [vmem:[#allocation7 + $0x8] sm:$0xff]  }
  0x2d   :  { %449 = vmatprep.subr.bf16.mxu1 %v596_v0  ;;  %v496_v22 = vld [vmem:[#allocation7 + $0x20] sm:$0xff]   ;;  %v388_v29 = vld [vmem:[%s658_s2] ss:$0 sm:$0xff]  ;;  %s598_s2 = smov [#allocation8]  }
  0x2e   :  { %v500_v27 = vld [vmem:[#allocation7] sm:$0xff]   ;;  %v407_v39 = vld [vmem:[%s660_s4] ss:$0 sm:$0xff]  ;;  %s378_s11 = sshll.u32 %s598_s2, 4  ;;  %s379_s11 = int_to_ptr.vmem [resolvable:$true] %s378_s11 }
  0x2f   :  { %421 = vmatpush3.bf16.msra.mxu0 %v480_v6  ;;  %450 = vmatpush3.bf16.msra.mxu1 %v494_v17  ;;  %s565_s4 = scalar_lea.vmem %s379_s11, 128  ;;  %p570_p2 = scmp.lt.s32.totalorder %s379_s11, %s379_s11 }
  0x30   :  { %422 = vmatprep.subr.bf16.mxu0 %v481_v7  ;;  %451 = vmatprep.subr.bf16.mxu1 %v596_v0  ;;  %p566_p1 = scmp.ne.s32.totalorder %s379_s11, %s565_s4  ;;  %p571_p3 = scmp.lt.s32.totalorder %s565_s4, %s565_s4 }
  0x32   :  { %p572_p4 = por %p571_p3, %p570_p2 }
  0x33   :  { %423 = vmatpush3.bf16.msra.mxu0 %v482_v8  ;;  %452 = vmatpush3.bf16.msra.mxu1 %v495_v20 }
  0x34   :  { %424 = vmatprep.subr.bf16.mxu0 %v483_v9  ;;  %453 = vmatprep.subr.bf16.mxu1 %v596_v0  ;;  %p573_p5 = pnand %p572_p4, %p566_p1 }
  0x37   :  { %425 = vmatpush3.bf16.msra.mxu0 %v484_v10  ;;  %454 = vmatpush3.bf16.msra.mxu1 %v496_v22 }
  0x38   :  { %426 = vmatprep.subr.bf16.mxu0 %v485_v11  ;;  %455 = vmatprep.subr.bf16.mxu1 %v596_v0 }
  0x3b   :  { %427 = vmatpush3.bf16.msra.mxu0 %v486_v15  ;;  %456 = vmatpush3.bf16.msra.mxu1 %v497_v24 }
  0x3c   :  { %428 = vmatprep.subr.bf16.mxu0 %v487_v16  ;;  %457 = vmatprep.subr.bf16.mxu1 %v596_v0 }
  0x3f   :  { %429 = vmatpush3.bf16.msra.mxu0 %v488_v18  ;;  %458 = vmatpush3.bf16.msra.mxu1 %v498_v25 }
  0x40   :  { %430 = vmatprep.subr.bf16.mxu0 %v489_v19  ;;  %459 = vmatprep.subr.bf16.mxu1 %v596_v0 }
  0x43   :  { %431 = vmatpush3.bf16.msra.mxu0 %v490_v21  ;;  %460 = vmatpush3.bf16.msra.mxu1 %v499_v26 }
  0x44   :  { %461 = vmatprep.subr.bf16.mxu1 %v596_v0 }
  0x46   :  { %237 = vmatmul.mubr.bf16.vlgmr.msra.gmra.mxu0 %v389_v23 }
  0x47   :  { %462 = vmatpush3.bf16.msra.mxu1 %v500_v27 }
 0x106   :  { %v432_v28 = vpop.f32.mrf.mxu0 }
 0x108   :  { %v433_v30 = vpop.f32.mrf.mxu0 }
 0x109   :  { %v434_v31 = vadd.f32 %v433_v30, %v432_v28 }
 0x10a   :  { %v435_v32 = vpop.f32.mrf.mxu0 }
 0x10b   :  { %v239_v33 = vadd.f32 %v434_v31, %v388_v29 }
 0x10c   :  { %v436_v34 = vpop.f32.mrf.mxu0 }
 0x10d   :  { %v244_v35 = vmax.f32 %v239_v33, 0.0 }
 0x10f   :  { %v245_v36 = vpack.c.bf16 %v244_v35, %v244_v35 }
 0x111   :  { %464 = vmatmul.mubr.bf16.vlgmr.msra.gmra.mxu1 %v245_v36 }
 0x1d1   :  { %v351_v40 = vpop.f32.mrf.mxu1 }
 0x1d2   :  { %v352_v41 = vadd.f32 %v407_v39, %v351_v40 }
 0x1d3   :  { %v465_v42 = vpop.f32.mrf.mxu1 }
 0x1d4   :  { %v360_v43 = vsel %vm359_vm1, %v352_v41, -inf }
 0x1d5   :  { %361 = vmax.xlane.f32.xlu0 %v360_v43  ;;  %v354_v44 = vpop.f32.mrf.mxu1 }
 0x1d7   :  { %v466_v45 = vpop.f32.mrf.mxu1 }
 0x25e   :  { %v362_v46 = vpop.xlane.xlu0 %361 }
 0x25f   :  { %v363_v47 = vsub.f32 %v360_v43, %v362_v46 }
 0x261   :  { %v364_v48 = vmul.f32 1.442695, %v363_v47 }
 0x263   :  { %501 = vpow2.f32 %v364_v48 }
 0x270   :  { %v502_v49 = vpop.eup %501 }
 0x271   :  { %366 = vadd.xlane.f32.xlu0 %v502_v49 }
 0x2fa   :  { %v367_v50 = vpop.xlane.xlu0 %366 }
 0x2fb   :  { %503 = vlog2.f32 %v367_v50 }
 0x308   :  { %v504_v51 = vpop.eup %503 }
 0x309   :  { %v369_v52 = vmul.f32 0.6931472, %v504_v51 }
 0x30b   :  { %v370_v53 = vsub.f32 %v363_v47, %v369_v52 }
 0x30d   :  { %371 = vst [vmem:[#allocation8] sm:$0xff] %v370_v53 }
 0x30e   :  { %576 = shalt.err (!%p573_p5)
}
 0x30f   :  { %381 = dma.vmem_to_hbm [thread:$0]  %s379_s11, 128, %s661_s5, [#allocation4]  }
 0x310   :  { %589 = dma.done.wait [#allocation4], 128  }
 0x311   :  { %590 = vsyncadd [#allocation4], 4294967168 }
 0x312   :  { %385 = vsyncpa [#allocation3], 1 }
 0x313   :  { %386 = vsyncpa [#allocation6], 1 }
 0x314   :  { %387 = vsyncpa [#allocation4], 1 }

</bundles_post_ra>
